<compile_context>
chip_gen: v7x
topology: tpu7x:2x2x1
jax: 0.10.0
libtpu: 0.0.40
codegen_flags: <defaults>
</compile_context>

<pallas_src>
import functools

import jax
import jax.numpy as jnp
from jax.experimental import pallas as pl
from jax.experimental.pallas import tpu as pltpu

_TB = 128  # batch tile = output lane width (multiple of 128 keeps the writeback lane-dense)


def _core_dp_kernel(total_b, tb, uid_ref, iid_ref, utab_ref, itab_ref, w_ref, b_ref,
                    out_ref, urows, irows, sem):
    t = pl.program_id(0)
    base = pl.multiple_of(t * tb, tb)

    # Number of real (non-padding) rows in this tile; padded lanes never leave the wrapper.
    n_valid = jnp.minimum(tb, total_b - base)

    # Phase 1: issue every row-gather DMA for this tile (all in flight at once).
    def _start(j, carry):
        u = uid_ref[base + j]
        i = iid_ref[base + j]
        pltpu.make_async_copy(utab_ref.at[pl.ds(u, 1), :],
                              urows.at[pl.ds(j, 1), :], sem.at[0]).start()
        pltpu.make_async_copy(itab_ref.at[pl.ds(i, 1), :],
                              irows.at[pl.ds(j, 1), :], sem.at[1]).start()
        return carry

    jax.lax.fori_loop(0, n_valid, _start, 0)

    # Phase 2: wait for all of them (every copy is one (1, D) row, so equal-size waits).
    def _wait(j, carry):
        pltpu.make_async_copy(utab_ref.at[pl.ds(0, 1), :],
                              urows.at[pl.ds(0, 1), :], sem.at[0]).wait()
        pltpu.make_async_copy(itab_ref.at[pl.ds(0, 1), :],
                              irows.at[pl.ds(0, 1), :], sem.at[1]).wait()
        return carry

    jax.lax.fori_loop(0, n_valid, _wait, 0)

    # fc(cat(u_emb, i_emb)) as a single lane-dense matvec:
    #   (1, 2D) x (TB, 2D) contracting 2D -> (1, TB); bias added at the store.
    x = jnp.concatenate([urows[...].astype(jnp.float32),
                         irows[...].astype(jnp.float32)], axis=1)      # (TB, 2D)
    out = jax.lax.dot_general(w_ref[...], x, (((1,), (1,)), ((), ())),
                              preferred_element_type=jnp.float32)       # (1, TB)
    out_ref[...] = out + b_ref[0]


def core_dp_forward(user_ids, item_ids, user_table, item_table, fc_w, fc_b, *, tb=_TB):
    """user_ids/item_ids: (B,) int; tables: (N, D); fc_w: (1, 2D); fc_b: (1,) -> (B,) f32."""
    B = user_ids.shape[0]
    U, D = user_table.shape
    I = item_table.shape[0]
    assert item_table.shape[1] == D and fc_w.shape == (1, 2 * D)

    B_pad = ((B + tb - 1) // tb) * tb
    nt = B_pad // tb

    # Clamp (PyTorch nn.Embedding would raise on OOB ids; clamping keeps DMAs in-bounds)
    # and pad with a valid id; padded lanes are dropped after the call.
    uid = jnp.zeros((B_pad,), jnp.int32).at[:B].set(
        jnp.clip(user_ids.astype(jnp.int32), 0, U - 1))
    iid = jnp.zeros((B_pad,), jnp.int32).at[:B].set(
        jnp.clip(item_ids.astype(jnp.int32), 0, I - 1))

    w = fc_w.astype(jnp.float32)                   # (1, 2D) — tiny, VMEM-resident
    bias = fc_b.reshape((1,)).astype(jnp.float32)  # SMEM scalar

    # Generation-aware-ish VMEM budget derived from the actual buffers (cap at 24 MiB
    # so the same kernel stays safe on v7x's 64 MiB physical VMEM).
    itemsize = jnp.dtype(user_table.dtype).itemsize
    scratch_bytes = 2 * tb * D * itemsize                  # gather buffers
    io_bytes = 2 * tb * 4 + 2 * 2 * D * 4                  # double-buffered out tile + fc_w
    vmem_limit = int(min(max(2 * (scratch_bytes + io_bytes) + (1 << 20), 4 << 20), 24 << 20))

    grid_spec = pltpu.PrefetchScalarGridSpec(
        num_scalar_prefetch=2,                    # uid, iid -> SMEM, read inside the kernel
        grid=(nt,),
        in_specs=[
            pl.BlockSpec(memory_space=pl.ANY),    # user table stays in HBM; rows DMA'd on demand
            pl.BlockSpec(memory_space=pl.ANY),    # item table stays in HBM
            pl.BlockSpec((1, 2 * D), lambda t, uids, iids: (0, 0)),   # fc weight
            pl.BlockSpec(memory_space=pltpu.MemorySpace.SMEM),        # bias
        ],
        out_specs=pl.BlockSpec((1, tb), lambda t, uids, iids: (0, t)),
        scratch_shapes=[
            pltpu.VMEM((tb, D), user_table.dtype),   # gathered user rows
            pltpu.VMEM((tb, D), item_table.dtype),   # gathered item rows
            pltpu.SemaphoreType.DMA((2,)),           # one DMA sem per table
        ],
    )

    out = pl.pallas_call(
        functools.partial(_core_dp_kernel, B, tb),
        out_shape=jax.ShapeDtypeStruct((1, B_pad), jnp.float32),
        grid_spec=grid_spec,
        compiler_params=pltpu.CompilerParams(
            dimension_semantics=("parallel",),
            vmem_limit_bytes=vmem_limit,
        ),
    )(uid, iid, user_table, item_table, w, bias)

    return out[0, :B]   # matches torch .squeeze(): (B, 1) -> (B,)


if __name__ == "__main__":
    key = jax.random.PRNGKey(0)
    k1, k2, k3, k4, k5, k6 = jax.random.split(key, 6)

    num_users, num_items, embed_dim, B = 32, 64, 16, 8

    # Deterministic synthetic parameters (no checkpoint).
    user_table = jax.random.normal(k1, (num_users, embed_dim), jnp.float32)
    item_table = jax.random.normal(k2, (num_items, embed_dim), jnp.float32)
    fc_w = jax.random.normal(k3, (1, 2 * embed_dim), jnp.float32) * 0.1
    fc_b = jax.random.normal(k4, (1,), jnp.float32) * 0.1

    user_ids = jax.random.randint(k5, (B,), 0, num_users, dtype=jnp.int32)
    item_ids = jax.random.randint(k6, (B,), 0, num_items, dtype=jnp.int32)

    out = core_dp_forward(user_ids, item_ids, user_table, item_table, fc_w, fc_b)
    out = jax.block_until_ready(out)

    # Pure-JAX reference: embedding gather + concat + linear + squeeze.
    ref = (jnp.concatenate([user_table[user_ids], item_table[item_ids]], axis=1)
           @ fc_w.T + fc_b).squeeze()
    assert out.shape == (B,), out.shape
    assert jnp.allclose(out, ref, atol=1e-5), (out, ref)

    print("KERNEL_OK")
</pallas_src>

<mosaic_0001>
module attributes {stable_mosaic.version = 11 : i64} {
  func.func @_core_dp_kernel(%arg0: i32, %arg1: memref<128xi32, #tpu.memory_space<smem>>, %arg2: memref<128xi32, #tpu.memory_space<smem>>, %arg3: memref<32x16xf32, #tpu.memory_space<any>>, %arg4: memref<64x16xf32, #tpu.memory_space<any>>, %arg5: memref<1x32xf32, #tpu.memory_space<vmem>>, %arg6: memref<1xf32, #tpu.memory_space<smem>>, %arg7: memref<1x128xf32, #tpu.memory_space<vmem>>, %arg8: memref<128x16xf32, #tpu.memory_space<vmem>>, %arg9: memref<128x16xf32, #tpu.memory_space<vmem>>, %arg10: memref<2x!tpu.dma_semaphore, #tpu.memory_space<semaphore_mem>>) attributes {dimension_semantics = [#tpu.dimension_semantics<parallel>], iteration_bounds = array<i64: 1>, scalar_prefetch = 2 : i64, scratch_operands = 3 : i64, tpu.core_type = #tpu.core_type<tc>, window_params = [{}, {}, {pipeline_mode = #tpu.pipeline_mode<synchronous>, transform_indices = @transform_2, window_bounds = array<i64: 1, 32>}, {transform_indices = @transform_3, window_bounds = array<i64: 1>}, {transform_indices = @transform_4, window_bounds = array<i64: 1, 128>}]} {
    %c128_i32 = arith.constant 128 : i32
    %0 = arith.muli %arg0, %c128_i32 : i32
    %1 = tpu.assume_multiple %0, 128 : i32
    %c8_i32 = arith.constant 8 : i32
    %2 = arith.subi %c8_i32, %1 : i32
    %c128_i32_0 = arith.constant 128 : i32
    %3 = arith.minsi %c128_i32_0, %2 : i32
    %c0_i32 = arith.constant 0 : i32
    %c0_i32_1 = arith.constant 0 : i32
    %4 = arith.subi %3, %c0_i32_1 : i32
    %5 = arith.addi %c0_i32_1, %4 : i32
    %c1_i32 = arith.constant 1 : i32
    scf.for %arg11 = %c0_i32_1 to %5 step %c1_i32  : i32 {
      %17 = arith.addi %1, %arg11 : i32
      %18 = arith.index_cast %17 : i32 to index
      %19 = memref.load %arg1[%18] : memref<128xi32, #tpu.memory_space<smem>>
      %20 = arith.addi %1, %arg11 : i32
      %21 = arith.index_cast %20 : i32 to index
      %22 = memref.load %arg2[%21] : memref<128xi32, #tpu.memory_space<smem>>
      %c0_i32_13 = arith.constant 0 : i32
      %c0_i32_14 = arith.constant 0 : i32
      %23 = tpu.memref_slice %arg3[%19, %c0_i32_14] : memref<32x16xf32, #tpu.memory_space<any>> -> memref<1x16xf32, #tpu.memory_space<any>>
      %c0_i32_15 = arith.constant 0 : i32
      %24 = tpu.memref_slice %arg8[%arg11, %c0_i32_15] : memref<128x16xf32, #tpu.memory_space<vmem>> -> memref<1x16xf32, #tpu.memory_space<vmem>>
      %25 = tpu.memref_slice %arg10[%c0_i32_13] : memref<2x!tpu.dma_semaphore, #tpu.memory_space<semaphore_mem>> -> memref<1x!tpu.dma_semaphore, #tpu.memory_space<semaphore_mem>>
      %26 = tpu.memref_squeeze %25 : memref<1x!tpu.dma_semaphore, #tpu.memory_space<semaphore_mem>> -> memref<!tpu.dma_semaphore, #tpu.memory_space<semaphore_mem>>
      tpu.enqueue_dma source(%23 : memref<1x16xf32, #tpu.memory_space<any>>) target(%24 : memref<1x16xf32, #tpu.memory_space<vmem>>) target_semaphore(%26 : memref<!tpu.dma_semaphore, #tpu.memory_space<semaphore_mem>>)
      %c1_i32_16 = arith.constant 1 : i32
      %c0_i32_17 = arith.constant 0 : i32
      %27 = tpu.memref_slice %arg4[%22, %c0_i32_17] : memref<64x16xf32, #tpu.memory_space<any>> -> memref<1x16xf32, #tpu.memory_space<any>>
      %c0_i32_18 = arith.constant 0 : i32
      %28 = tpu.memref_slice %arg9[%arg11, %c0_i32_18] : memref<128x16xf32, #tpu.memory_space<vmem>> -> memref<1x16xf32, #tpu.memory_space<vmem>>
      %29 = tpu.memref_slice %arg10[%c1_i32_16] : memref<2x!tpu.dma_semaphore, #tpu.memory_space<semaphore_mem>> -> memref<1x!tpu.dma_semaphore, #tpu.memory_space<semaphore_mem>>
      %30 = tpu.memref_squeeze %29 : memref<1x!tpu.dma_semaphore, #tpu.memory_space<semaphore_mem>> -> memref<!tpu.dma_semaphore, #tpu.memory_space<semaphore_mem>>
      tpu.enqueue_dma source(%27 : memref<1x16xf32, #tpu.memory_space<any>>) target(%28 : memref<1x16xf32, #tpu.memory_space<vmem>>) target_semaphore(%30 : memref<!tpu.dma_semaphore, #tpu.memory_space<semaphore_mem>>)
    }
    %c0_i32_2 = arith.constant 0 : i32
    %c0_i32_3 = arith.constant 0 : i32
    %6 = arith.subi %3, %c0_i32_3 : i32
    %7 = arith.addi %c0_i32_3, %6 : i32
    %c1_i32_4 = arith.constant 1 : i32
    scf.for %arg11 = %c0_i32_3 to %7 step %c1_i32_4  : i32 {
      %c0_i32_13 = arith.constant 0 : i32
      %c0_i32_14 = arith.constant 0 : i32
      %c0_i32_15 = arith.constant 0 : i32
      %17 = tpu.memref_slice %arg3[%c0_i32_14, %c0_i32_15] : memref<32x16xf32, #tpu.memory_space<any>> -> memref<1x16xf32, #tpu.memory_space<any>>
      %c0_i32_16 = arith.constant 0 : i32
      %c0_i32_17 = arith.constant 0 : i32
      %18 = tpu.memref_slice %arg8[%c0_i32_16, %c0_i32_17] : memref<128x16xf32, #tpu.memory_space<vmem>> -> memref<1x16xf32, #tpu.memory_space<vmem>>
      %19 = tpu.memref_slice %arg10[%c0_i32_13] : memref<2x!tpu.dma_semaphore, #tpu.memory_space<semaphore_mem>> -> memref<1x!tpu.dma_semaphore, #tpu.memory_space<semaphore_mem>>
      %20 = tpu.memref_squeeze %19 : memref<1x!tpu.dma_semaphore, #tpu.memory_space<semaphore_mem>> -> memref<!tpu.dma_semaphore, #tpu.memory_space<semaphore_mem>>
      tpu.wait_dma2 semaphore(%20 : memref<!tpu.dma_semaphore, #tpu.memory_space<semaphore_mem>>) src(%17 : memref<1x16xf32, #tpu.memory_space<any>>) dst(%18 : memref<1x16xf32, #tpu.memory_space<vmem>>)
      %c1_i32_18 = arith.constant 1 : i32
      %c0_i32_19 = arith.constant 0 : i32
      %c0_i32_20 = arith.constant 0 : i32
      %21 = tpu.memref_slice %arg4[%c0_i32_19, %c0_i32_20] : memref<64x16xf32, #tpu.memory_space<any>> -> memref<1x16xf32, #tpu.memory_space<any>>
      %c0_i32_21 = arith.constant 0 : i32
      %c0_i32_22 = arith.constant 0 : i32
      %22 = tpu.memref_slice %arg9[%c0_i32_21, %c0_i32_22] : memref<128x16xf32, #tpu.memory_space<vmem>> -> memref<1x16xf32, #tpu.memory_space<vmem>>
      %23 = tpu.memref_slice %arg10[%c1_i32_18] : memref<2x!tpu.dma_semaphore, #tpu.memory_space<semaphore_mem>> -> memref<1x!tpu.dma_semaphore, #tpu.memory_space<semaphore_mem>>
      %24 = tpu.memref_squeeze %23 : memref<1x!tpu.dma_semaphore, #tpu.memory_space<semaphore_mem>> -> memref<!tpu.dma_semaphore, #tpu.memory_space<semaphore_mem>>
      tpu.wait_dma2 semaphore(%24 : memref<!tpu.dma_semaphore, #tpu.memory_space<semaphore_mem>>) src(%21 : memref<1x16xf32, #tpu.memory_space<any>>) dst(%22 : memref<1x16xf32, #tpu.memory_space<vmem>>)
    }
    %c0 = arith.constant 0 : index
    %c0_5 = arith.constant 0 : index
    %8 = vector.load %arg8[%c0, %c0_5] : memref<128x16xf32, #tpu.memory_space<vmem>>, vector<128x16xf32>
    %c0_6 = arith.constant 0 : index
    %c0_7 = arith.constant 0 : index
    %9 = vector.load %arg9[%c0_6, %c0_7] : memref<128x16xf32, #tpu.memory_space<vmem>>, vector<128x16xf32>
    %10 = tpu.concatenate %8, %9 in 1 : vector<128x16xf32>, vector<128x16xf32> -> vector<128x32xf32>
    %c0_8 = arith.constant 0 : index
    %c0_9 = arith.constant 0 : index
    %11 = vector.load %arg5[%c0_8, %c0_9] : memref<1x32xf32, #tpu.memory_space<vmem>>, vector<1x32xf32>
    %cst = arith.constant dense<0.000000e+00> : vector<1x128xf32>
    %12 = tpu.matmul %11, %10, %cst {dimension_numbers = #tpu.dot_dimension_numbers<[1], [1], [0], [0], [0, 0, 1, 0], [], []>} : vector<1x32xf32>, vector<128x32xf32>, vector<1x128xf32> -> vector<1x128xf32>
    %c0_10 = arith.constant 0 : index
    %13 = memref.load %arg6[%c0_10] : memref<1xf32, #tpu.memory_space<smem>>
    %14 = vector.broadcast %13 : f32 to vector<1x128xf32>
    %15 = arith.addf %12, %14 : vector<1x128xf32>
    %c0_11 = arith.constant 0 : index
    %c0_12 = arith.constant 0 : index
    %16 = vector.load %arg7[%c0_11, %c0_12] : memref<1x128xf32, #tpu.memory_space<vmem>>, vector<1x128xf32>
    tpu.vector_store %arg7[%c0_11, %c0_12], %15 {strides = array<i32>} : memref<1x128xf32, #tpu.memory_space<vmem>>, vector<1x128xf32>,
    return
  }
  func.func @transform_2(%arg0: i32, %arg1: memref<128xi32, #tpu.memory_space<smem>>, %arg2: memref<128xi32, #tpu.memory_space<smem>>) -> (i32, i32) {
    %c0_i32 = arith.constant 0 : i32
    %c0_i32_0 = arith.constant 0 : i32
    %c0_i32_1 = arith.constant 0 : i32
    return %c0_i32, %c0_i32_0 : i32, i32
  }
  func.func @transform_3(%arg0: i32, %arg1: memref<128xi32, #tpu.memory_space<smem>>, %arg2: memref<128xi32, #tpu.memory_space<smem>>) -> i32 {
    %c0_i32 = arith.constant 0 : i32
    %c0_i32_0 = arith.constant 0 : i32
    return %c0_i32 : i32
  }
  func.func @transform_4(%arg0: i32, %arg1: memref<128xi32, #tpu.memory_space<smem>>, %arg2: memref<128xi32, #tpu.memory_space<smem>>) -> (i32, i32) {
    %c0_i32 = arith.constant 0 : i32
    %c0_i32_0 = arith.constant 0 : i32
    return %c0_i32, %arg0 : i32, i32
  }
}

</mosaic_0001>

<bundles_post_ra>
// kernel: tpu_custom_call.1
= control target key start
LH: loop header
LB: loop body
LE: loop exit
PB: predicated region body
PF: predicated region fallthrough
CT: control target
= control target key end

     0   :  { %s800_s0 = inlined_call_operand.vmem [shape: s32[128], index: 0, kind: input, shape index: {}]   ;;  %s801_s2 = inlined_call_operand.vmem [shape: f32[32,16], index: 2, kind: input, shape index: {}]   ;;  %s802_s3 = inlined_call_operand.vmem [shape: f32[64,16], index: 3, kind: input, shape index: {}]   ;;  %s803_s4 = inlined_call_operand.vmem [shape: f32[1,32], index: 4, kind: input, shape index: {}]   ;;  %s804_s6 = inlined_call_operand.hbm [shape: f32[1,128], index: 6, kind: output, shape index: {}]   ;;  %s805_s1 = inlined_call_operand.vmem [shape: s32[128], index: 1, kind: input, shape index: {}]   ;;  %s806_s5 = inlined_call_operand.<no memory space> [shape: f32[1], index: 5, kind: input, shape index: {}]  }
   0x1   :  { %s11_s23 = sshll.u32 %s800_s0, 4  ;;  %s15_s26 = sshll.u32 %s805_s1, 4  ;;  %s12_s23 = int_to_ptr.vmem [resolvable:$true] %s11_s23  ;;  %s16_s26 = int_to_ptr.vmem [resolvable:$true] %s15_s26 }
   0x2   :  { %s611_s27 = scalar_lea.vmem %s12_s23, 16  ;;  %p616_p1 = scmp.lt.s32.totalorder %s12_s23, %s12_s23 }
   0x3   :  { %p612_p0 = scmp.ne.s32.totalorder %s12_s23, %s611_s27  ;;  %p617_p2 = scmp.lt.s32.totalorder %s611_s27, %s611_s27 }
   0x5   :  { %p618_p3 = por %p617_p2, %p616_p1 }
   0x7   :  { %p619_p4 = pnand %p618_p3, %p612_p0 }
   0x9   :  { %622 = shalt.err (!%p619_p4)  }
   0xa   :  { %s681_s28 = smov [#allocation6]   ;;  %s623_s29 = scalar_lea.vmem %s16_s26, 16 }
   0xb   :  { %14 = dma.vmem_to_smem %s12_s23, 16, %s681_s28, [#allocation5] }
   0xc   :  { %p624_p5 = scmp.ne.s32.totalorder %s16_s26, %s623_s29  ;;  %p628_p6 = scmp.lt.s32.totalorder %s16_s26, %s16_s26 }
   0xd   :  { %p629_p7 = scmp.lt.s32.totalorder %s623_s29, %s623_s29 }
   0xf   :  { %p630_p8 = por %p629_p7, %p628_p6 }
  0x11   :  { %p631_p9 = pnand %p630_p8, %p624_p5 }
  0x13   :  { %634 = shalt.err (!%p631_p9)  }
  0x14   :  { %s682_s0 = smov [#allocation7]   ;;  %19 = sst [smem:[#allocation8]] %s806_s5 }
  0x15   :  { %18 = dma.vmem_to_smem %s16_s26, 16, %s682_s0, [#allocation5] }
  0x16   :  { %665 = dma.done.wait [#allocation5], 32 }
  0x17   :  { %666 = vsyncadd [#allocation5], 4294967264 }
  0x18   :  { %21 = sfence }
  0x19   :  { %22 = vsyncpa [#allocation10], 0  ;;  %s673_s7 = smov 0  }
  0x1a LB: > { %s38_s8 = sld [smem:[#allocation6 + %s675_s7]]  ;;  %s41_s13 = scalar_lea.vmem [#allocation2], %s675_s7  ;;  %s675_s7 = sphi %s673_s7, %s34_s7  }
  0x1b   : > { %s39_s9 = sld [smem:[#allocation7 + %s675_s7]] }
  0x20   : > { %s40_s12 = scalar_lea.vmem %s801_s2, %s38_s8 }
  0x21   : > { %v59_v0 = vld [vmem:[%s40_s12] sm:$0x1] }
  0x22   : > { %60 = vst [vmem:[%s41_s13] sm:$0x1] %v59_v0 }
  0x23   : > { %85 = vsyncadd [#allocation4], 16  ;;  %s86_s15 = scalar_lea.vmem %s802_s3, %s39_s9  ;;  %s87_s16 = scalar_lea.vmem [#allocation3], %s675_s7 }
  0x24   : > { %v106_v1 = vld [vmem:[%s86_s15] sm:$0x1] }
  0x25   : > { %107 = vst [vmem:[%s87_s16] sm:$0x1] %v106_v1 }
  0x26   : > { %132 = vsyncadd [#allocation4 + $0x1], 16  ;;  %s34_s7 = sadd.s32 1, %s675_s7  }
  0x27   : > { %p33_p10 = scmp.ge.s32.totalorder %s34_s7, 8 }
  0x28   :  { %s677_s17 = smov (%p33_p10), 0  }
  0x29   :  { %36 = sbr.rel (!%p33_p10) target bundleno = 26 (0x1a), region = 129 }
  0x30 LB: > { %667 = dma.done.wait [#allocation4], 16  ;;  %s679_s17 = sphi %s677_s17, %s136_s17  }
  0x31   : > { %668 = vsyncadd [#allocation4], 4294967280 }
  0x32   : > { %669 = dma.done.wait [#allocation4 + $0x1], 16 }
  0x33   : > { %670 = vsyncadd [#allocation4 + $0x1], 4294967280  ;;  %s136_s17 = sadd.s32 1, %s679_s17  }
  0x34   : > { %p135_p11 = scmp.ge.s32.totalorder %s136_s17, 8 }
  0x35   :  { %v161_v2 = vld [vmem:[#allocation3] sm:$0xff] (%p135_p11)  ;;  %v162_v3 = vld [vmem:[#allocation3 + $0x8] sm:$0xff] (%p135_p11)  ;;  %v163_v4 = vld [vmem:[#allocation3 + $0x10] sm:$0xff] (%p135_p11)  ;;  %v683_v9 = vmov (%p135_p11), 0.0|0.0   ;;  %s684_s2 = smov (%p135_p11), 16   ;;  %vm685_vm0 = vmmov (%p135_p11), 0  }
  0x36   :  { %138 = sbr.rel (!%p135_p11) target bundleno = 48 (0x30), region = 140  ;;  %v571_v5 = vpack.i.bf16 (%p135_p11), %v162_v3, %v161_v2  ;;  %v164_v6 = vld [vmem:[#allocation3 + $0x18] sm:$0xff] (%p135_p11)  ;;  %v165_v7 = vld [vmem:[#allocation3 + $0x20] sm:$0xff] (%p135_p11)  ;;  %v166_v8 = vld [vmem:[#allocation3 + $0x28] sm:$0xff] (%p135_p11)  ;;  %516 = vmatprep.subr.bf16.mxu0 (%p135_p11), %v683_v9  ;;  %v686_v27 = vmov (%p135_p11), 0.0   ;;  %vm241_vm1 = vcmask (%p135_p11), 130048  }
  0x37   :  { %v581_v10 = vpack.i.bf16 (%p135_p11), %v166_v8, %v165_v7  ;;  %v167_v11 = vld [vmem:[#allocation3 + $0x30] sm:$0xff] (%p135_p11)  ;;  %v168_v12 = vld [vmem:[#allocation3 + $0x38] sm:$0xff] (%p135_p11)  ;;  %v576_v13 = vpack.i.bf16 (%p135_p11), %v164_v6, %v163_v4  ;;  %v169_v15 = vld [vmem:[#allocation3 + $0x40] sm:$0xff] (%p135_p11)  ;;  %513 = vmatprep.mubr.msk.f32.mxu0 (%p135_p11), %vm685_vm0, %v686_v27  ;;  %vm261_vm2 = vcmask (%p135_p11), 261120   ;;  %s259_s19 = sld [smem:[#allocation8]] (%p135_p11)  ;;  %s687_s20 = smov (%p135_p11), [#allocation9]  }
  0x38   :  { %572 = vrot.lane.b32.xlu0 (%p135_p11), %v571_v5, %s684_s2  ;;  %v586_v14 = vpack.i.bf16 (%p135_p11), %v168_v12, %v167_v11  ;;  %v170_v16 = vld [vmem:[#allocation3 + $0x48] sm:$0xff] (%p135_p11)  ;;  %v171_v17 = vld [vmem:[#allocation3 + $0x50] sm:$0xff] (%p135_p11)  ;;  %v172_v18 = vld [vmem:[#allocation3 + $0x58] sm:$0xff] (%p135_p11)  ;;  %s390_s21 = sshll.u32 (%p135_p11), %s687_s20, 4  ;;  %s391_s21 = int_to_ptr.vmem [resolvable:$true] %s390_s21 }
  0x39   :  { %582 = vrot.lane.b32.xlu1 (%p135_p11), %v581_v10, %s684_s2  ;;  %v591_v19 = vpack.i.bf16 (%p135_p11), %v170_v16, %v169_v15  ;;  %v596_v20 = vpack.i.bf16 (%p135_p11), %v172_v18, %v171_v17  ;;  %v173_v21 = vld [vmem:[#allocation3 + $0x60] sm:$0xff] (%p135_p11)  ;;  %v174_v22 = vld [vmem:[#allocation3 + $0x68] sm:$0xff] (%p135_p11)  ;;  %v175_v23 = vld [vmem:[#allocation3 + $0x70] sm:$0xff] (%p135_p11)  ;;  %s635_s22 = scalar_lea.vmem (%p135_p11), %s391_s21, 16  ;;  %s639_s23 = scalar_lea.vmem (%p135_p11), %s391_s21, 32 }
  0x3a   :  { %v176_v24 = vld [vmem:[#allocation3 + $0x78] sm:$0xff] (%p135_p11)  ;;  %v601_v25 = vpack.i.bf16 (%p135_p11), %v174_v22, %v173_v21  ;;  %v145_v29 = vld [vmem:[#allocation2] sm:$0xff] (%p135_p11)  ;;  %v146_v30 = vld [vmem:[#allocation2 + $0x8] sm:$0xff] (%p135_p11)  ;;  %p636_p12 = scmp.ne.s32.totalorder (%p135_p11), %s391_s21, %s635_s22  ;;  %p640_p13 = scmp.lt.s32.totalorder (%p135_p11), %s391_s21, %s391_s21 }
  0x3b   :  { %v606_v26 = vpack.i.bf16 (%p135_p11), %v176_v24, %v175_v23  ;;  %vm743_vm3 = vmpackc.low (%p135_p11), %vm261_vm2, %vm261_vm2  ;;  %v147_v38 = vld [vmem:[#allocation2 + $0x10] sm:$0xff] (%p135_p11)  ;;  %v148_v39 = vld [vmem:[#allocation2 + $0x18] sm:$0xff] (%p135_p11)  ;;  %p641_p0 = scmp.lt.s32.totalorder (%p135_p11), %s639_s23, %s635_s22 }
  0x3c   :  { %577 = vrot.lane.b32.xlu0 (%p135_p11), %v576_v13, %s684_s2  ;;  %v149_v48 = vld [vmem:[#allocation2 + $0x20] sm:$0xff] (%p135_p11)  ;;  %v150_v49 = vld [vmem:[#allocation2 + $0x28] sm:$0xff] (%p135_p11)  ;;  %v151_v56 = vld [vmem:[#allocation2 + $0x30] sm:$0xff] (%p135_p11) }
  0x3d   :  { %587 = vrot.lane.b32.xlu1 %v586_v14, %s684_s2  ;;  %v152_v57 = vld [vmem:[#allocation2 + $0x38] sm:$0xff]  ;;  %v153_v0 = vld [vmem:[#allocation2 + $0x40] sm:$0xff]  ;;  %v154_v1 = vld [vmem:[#allocation2 + $0x48] sm:$0xff]  ;;  %p642_p1 = por %p641_p0, %p640_p13 }
  0x3e   :  { %v155_v8 = vld [vmem:[#allocation2 + $0x50] sm:$0xff]  ;;  %v156_v10 = vld [vmem:[#allocation2 + $0x58] sm:$0xff]  ;;  %v157_v17 = vld [vmem:[#allocation2 + $0x60] sm:$0xff] }
  0x3f   :  { %v158_v18 = vld [vmem:[#allocation2 + $0x68] sm:$0xff]  ;;  %p643_p2 = pnand %p642_p1, %p636_p12 }
  0x40   :  { %592 = vrot.lane.b32.xlu0 %v591_v19, %s684_s2 }
  0x41   :  { %597 = vrot.lane.b32.xlu1 %v596_v20, %s684_s2 }
  0x44   :  { %602 = vrot.lane.b32.xlu0 %v601_v25, %s684_s2  ;;  %v159_v25 = vld [vmem:[#allocation2 + $0x70] sm:$0xff] }
  0x45   :  { %607 = vrot.lane.b32.xlu1 %v606_v26, %s684_s2  ;;  %v160_v26 = vld [vmem:[#allocation2 + $0x78] sm:$0xff] }
  0xaa   :  { %v573_v28 = vpop.permute.xlu0 %572 }
  0xab   :  { %v575_v31 = vunpack.i.h.bf16 %v573_v28  ;;  %v574_v32 = vunpack.i.l.bf16 %v573_v28  ;;  %v583_v44 = vpop.permute.xlu1 %582 }
  0xac   :  { %v585_v46 = vunpack.i.h.bf16 %v583_v44  ;;  %v584_v47 = vunpack.i.l.bf16 %v583_v44 }
  0xad   :  { %v242_v33 = vsel %vm241_vm1, %v145_v29, %v574_v32  ;;  %v243_v34 = vsel %vm241_vm1, %v146_v30, %v575_v31  ;;  %v258_v30 = vld [vmem:[%s803_s4] sm:$0x1]  ;;  %v260_v31 = vstv %s259_s19 }
  0xae   :  { %v517_v36 = vpack.c.bf16 %v243_v34, %v242_v33  ;;  %v578_v37 = vpop.permute.xlu0 %577  ;;  %v246_v50 = vsel %vm241_vm1, %v149_v48, %v584_v47  ;;  %v247_v51 = vsel %vm241_vm1, %v150_v49, %v585_v46 }
  0xaf   :  { %v580_v40 = vunpack.i.h.bf16 %v578_v37  ;;  %v579_v41 = vunpack.i.l.bf16 %v578_v37  ;;  %v588_v52 = vpop.permute.xlu1 %587  ;;  %v525_v53 = vpack.c.bf16 %v247_v51, %v246_v50 }
  0xb0   :  { %519 = vmatpush3.bf16.xpose.msk.msra.mxu0 %vm743_vm3, %v517_v36  ;;  %v590_v54 = vunpack.i.h.bf16 %v588_v52  ;;  %v589_v55 = vunpack.i.l.bf16 %v588_v52 }
  0xb1   :  { %v244_v42 = vsel %vm241_vm1, %v147_v38, %v579_v41  ;;  %v245_v43 = vsel %vm241_vm1, %v148_v39, %v580_v40  ;;  %520 = vmatprep.subr.bf16.mxu0 %v683_v9 }
  0xb2   :  { %v521_v45 = vpack.c.bf16 %v245_v43, %v244_v42  ;;  %v248_v58 = vsel %vm241_vm1, %v151_v56, %v589_v55  ;;  %v249_v59 = vsel %vm241_vm1, %v152_v57, %v590_v54  ;;  %v593_v60 = vpop.permute.xlu0 %592 }
  0xb3   :  { %v529_v61 = vpack.c.bf16 %v249_v59, %v248_v58  ;;  %v595_v62 = vunpack.i.h.bf16 %v593_v60  ;;  %v594_v63 = vunpack.i.l.bf16 %v593_v60  ;;  %v598_v4 = vpop.permute.xlu1 %597 }
  0xb4   :  { %v600_v6 = vunpack.i.h.bf16 %v598_v4  ;;  %v599_v7 = vunpack.i.l.bf16 %v598_v4 }
  0xb5   :  { %v250_v2 = vsel %vm241_vm1, %v153_v0, %v594_v63  ;;  %v251_v3 = vsel %vm241_vm1, %v154_v1, %v595_v62 }
  0xb6   :  { %v533_v5 = vpack.c.bf16 %v251_v3, %v250_v2  ;;  %v252_v11 = vsel %vm241_vm1, %v155_v8, %v599_v7  ;;  %v253_v12 = vsel %vm241_vm1, %v156_v10, %v600_v6  ;;  %v603_v13 = vpop.permute.xlu0 %602 }
  0xb7   :  { %v537_v14 = vpack.c.bf16 %v253_v12, %v252_v11  ;;  %v605_v15 = vunpack.i.h.bf16 %v603_v13  ;;  %v604_v16 = vunpack.i.l.bf16 %v603_v13  ;;  %v608_v21 = vpop.permute.xlu1 %607 }
  0xb8   :  { %523 = vmatpush3.bf16.xpose.msk.msra.mxu0 %vm743_vm3, %v521_v45  ;;  %v610_v23 = vunpack.i.h.bf16 %v608_v21  ;;  %v609_v24 = vunpack.i.l.bf16 %v608_v21 }
  0xb9   :  { %524 = vmatprep.subr.bf16.mxu0 %v683_v9  ;;  %v254_v19 = vsel %vm241_vm1, %v157_v17, %v604_v16  ;;  %v255_v20 = vsel %vm241_vm1, %v158_v18, %v605_v15 }
  0xba   :  { %v541_v22 = vpack.c.bf16 %v255_v20, %v254_v19  ;;  %v256_v27 = vsel %vm241_vm1, %v159_v25, %v609_v24  ;;  %v257_v28 = vsel %vm241_vm1, %v160_v26, %v610_v23 }
  0xbb   :  { %v545_v29 = vpack.c.bf16 %v257_v28, %v256_v27 }
  0xc0   :  { %527 = vmatpush3.bf16.xpose.msk.msra.mxu0 %vm743_vm3, %v525_v53 }
  0xc1   :  { %528 = vmatprep.subr.bf16.mxu0 %v683_v9 }
  0xc8   :  { %531 = vmatpush3.bf16.xpose.msk.msra.mxu0 %vm743_vm3, %v529_v61 }
  0xc9   :  { %532 = vmatprep.subr.bf16.mxu0 %v683_v9 }
  0xd0   :  { %535 = vmatpush3.bf16.xpose.msk.msra.mxu0 %vm743_vm3, %v533_v5 }
  0xd1   :  { %536 = vmatprep.subr.bf16.mxu0 %v683_v9 }
  0xd8   :  { %539 = vmatpush3.bf16.xpose.msk.msra.mxu0 %vm743_vm3, %v537_v14 }
  0xd9   :  { %540 = vmatprep.subr.bf16.mxu0 %v683_v9 }
  0xe0   :  { %543 = vmatpush3.bf16.xpose.msk.msra.mxu0 %vm743_vm3, %v541_v22 }
  0xe1   :  { %544 = vmatprep.subr.bf16.mxu0 %v683_v9 }
  0xe8   :  { %547 = vmatpush3.bf16.xpose.msk.msra.mxu0 %vm743_vm3, %v545_v29 }
  0xef   :  { %514 = vmatmul.mubr.msk.f32.vlgmr.msra.gmra.mrb[0].mxu0 %vm261_vm2, %v258_v30 }
 0x1c2   :  { %v379_v32 = vpop.f32.mrb[0].mxu0 }
 0x1c3   :  { %v380_v33 = vadd.f32 %v379_v32, %v260_v31  ;;  %v515_v34 = vpop.f32.mrb[1].mxu0 }
 0x1c5   :  { %383 = vst [vmem:[#allocation9] sm:$0x1] %v380_v33 }
 0x1c6   :  { %646 = shalt.err (!%p643_p2)
}
 0x1c7   :  { %s647_s25 = scalar_lea.hbm %s804_s6, 16 }
 0x1c8   :  { %p648_p3 = scmp.ne.s32.totalorder %s804_s6, %s647_s25  ;;  %p651_p4 = scmp.lt.u32.totalorder %s647_s25, %s804_s6 }
 0x1ca   :  { %p653_p5 = pnand %p651_p4, %p648_p3 }
 0x1cc   :  { %656 = shalt.err (!%p653_p5)
}
 0x1cd   :  { %393 = dma.vmem_to_hbm [thread:$0]  %s391_s21, 16, %s804_s6, [#allocation10]  }
 0x1ce   :  { %671 = dma.done.wait [#allocation10], 16  }
 0x1cf   :  { %672 = vsyncadd [#allocation10], 4294967280 }
 0x1d0   :  { %397 = vsyncpa [#allocation10], 1 }
 0x1d1   :  { %398 = vsyncmov [#allocation4] }
 0x1d4   :  { %s399_s30 = vpop.sfrf %398 }
 0x1d5   :  { %p462_p6 = scmp.ne.s32.totalorder %s399_s30, 0 }
 0x1d7   :  { %403 = shalt.err (%p462_p6)  }
 0x1d8   :  { %405 = vsyncmov [#allocation4 + $0x1] }
 0x1db   :  { %s406_s7 = vpop.sfrf %405 }
 0x1dc   :  { %p463_p7 = scmp.ne.s32.totalorder %s406_s7, 0 }
 0x1de   :  { %410 = shalt.err (%p463_p7)  }

</bundles_post_ra>
